<compile_context>
chip_gen: v7x
topology: tpu7x:2x2x1
jax: 0.10.0
libtpu: 0.0.40
codegen_flags: <defaults>
</compile_context>

<pallas_src>
import math

import jax
import jax.numpy as jnp
from jax.experimental import pallas as pl
from jax.experimental.pallas import tpu as pltpu


# ----------------------------- Pallas kernel ------------------------------ #

def _funnel_nchw_kernel(x_ref, w_ref, b_ref, o_ref):
    # x_ref: (1, tile_hw, K)   activation tiles (channels-last rows)
    # w_ref: (N, K)            torch Linear weight layout (resident, tiny)
    # b_ref: (N, 1)            bias column (broadcast along the lane axis)
    # o_ref: (1, N, tile_hw)   output block, already channels-first, lane-dense
    zt = jax.lax.dot_general(
        w_ref[...], x_ref[0],
        dimension_numbers=(((1,), (1,)), ((), ())),      # contract K with K
        preferred_element_type=jnp.float32)              # -> (N, tile_hw) f32
    o_ref[0] = (zt + b_ref[...]).astype(o_ref.dtype)


def funnel_linear_nchw_pallas(x_bhwf, weight, bias_col, *, tile_hw_target=1024):
    """Fused funnel-linear + channels-first emit.

    x_bhwf:   [B, HW, K]  channels-last tile rows
    weight:   [N, K]      torch nn.Linear layout (not transposed)
    bias_col: [N, 1]
    returns:  [B, N, HW]  (reshape to [B, N, Ht, Wt] is free)
    """
    B, HW, K = x_bhwf.shape
    N = weight.shape[0]

    # Spatial row tile: lane-dense multiple of 128 if HW is large, otherwise a
    # single full-extent block (full-dim blocks satisfy the (8,128) rule).
    if HW <= tile_hw_target:
        tile_hw = HW
    else:
        tile_hw = max((tile_hw_target // 128) * 128, 128)

    grid = (B, pl.cdiv(HW, tile_hw))

    cost = pl.CostEstimate(
        flops=2 * B * HW * K * N,
        transcendentals=0,
        bytes_accessed=4 * (B * HW * K + K * N + B * HW * N),
    )

    grid_spec = pltpu.PrefetchScalarGridSpec(
        num_scalar_prefetch=0,
        grid=grid,
        in_specs=[
            pl.BlockSpec((1, tile_hw, K), lambda b, s: (b, s, 0)),
            pl.BlockSpec((N, K), lambda b, s: (0, 0)),   # constant block -> fetched once
            pl.BlockSpec((N, 1), lambda b, s: (0, 0)),
        ],
        out_specs=pl.BlockSpec((1, N, tile_hw), lambda b, s: (b, 0, s)),
    )

    return pl.pallas_call(
        _funnel_nchw_kernel,
        out_shape=jax.ShapeDtypeStruct((B, N, HW), x_bhwf.dtype),
        grid_spec=grid_spec,
        compiler_params=pltpu.CompilerParams(
            dimension_semantics=("parallel", "parallel")),
        cost_estimate=cost,
    )(x_bhwf, weight, bias_col)


# ------------------------------ Module glue ------------------------------- #

class KernelPallas:
    """JAX/Pallas port of models/layers/conv_kernel.py::Kernel (forward)."""

    def __init__(self, in_channels, out_channels, kernel_size, stride, key):
        del stride  # only used by the (external) tiling step, not the funnel
        in_features = kernel_size[0] * kernel_size[1] * in_channels
        out_features = out_channels
        self.in_features = in_features
        self.out_features = out_features

        # Deterministic init (torch.nn.Linear default: U(-1/sqrt(fan_in), ..)).
        kw, kb = jax.random.split(key)
        bound = 1.0 / math.sqrt(in_features)
        self.weight = jax.random.uniform(
            kw, (out_features, in_features), jnp.float32, -bound, bound)
        self.bias = jax.random.uniform(
            kb, (out_features,), jnp.float32, -bound, bound)
        # Hoisted once: column layout for the in-kernel lane-broadcast add.
        self.bias_col = self.bias.reshape(out_features, 1)

    def __call__(self, tiles, flag):
        # tiles: [B, Ht, Wt, in_features]  (channels-last tiles)
        B, Ht, Wt, F = tiles.shape
        assert F == self.in_features

        x = tiles.reshape(B, Ht * Wt, F)                       # free reshape
        z_ncl = funnel_linear_nchw_pallas(x, self.weight, self.bias_col)
        z_nchw = z_ncl.reshape(B, self.out_features, Ht, Wt)   # free reshape (NCHW)

        # log-Jacobian of the funnel map: 0.5 * logdet(W W^T) per spatial tile.
        # Tiny (out_features x out_features) parameter-only op -> plain JAX.
        # TODO(synk): a Cholesky-based half-logdet is slightly more stable for
        #             near-rank-deficient W; slogdet kept for simplicity.
        if flag:
            gram = self.weight @ self.weight.T
            half_logdet = 0.5 * jnp.linalg.slogdet(gram)[1]
            logL_sum = jnp.full((B,), half_logdet * (Ht * Wt), jnp.float32)
        else:
            logL_sum = jnp.zeros((B,), jnp.float32)

        # Matches torch: z.permute(0, 3, 1, 2), logL.flatten(1).sum(1)
        return z_nchw, logL_sum

    # TODO(synk): inverse() (pseudo-inverse of the funnel) not implemented;
    # only forward is required here.


# --------------------------------- main ----------------------------------- #

if __name__ == "__main__":
    key = jax.random.PRNGKey(0)
    k_param, k_x = jax.random.split(key)

    in_channels, out_channels = 8, 16
    kernel_size, stride = (4, 4), (4, 4)
    B, Ht, Wt = 2, 8, 8
    in_features = kernel_size[0] * kernel_size[1] * in_channels  # 128

    mod = KernelPallas(in_channels, out_channels, kernel_size, stride, k_param)

    tiles = jax.random.normal(k_x, (B, Ht, Wt, in_features), jnp.float32)

    z, logL = mod(tiles, flag=True)
    z = jax.block_until_ready(z)
    logL = jax.block_until_ready(logL)

    # Sanity: check against a plain-JAX reference of the same math.
    ref = tiles.reshape(-1, in_features) @ mod.weight.T + mod.bias
    ref = jnp.transpose(ref.reshape(B, Ht, Wt, out_channels), (0, 3, 1, 2))
    assert z.shape == (B, out_channels, Ht, Wt)
    assert logL.shape == (B,)
    assert jnp.allclose(z, ref, atol=1e-5, rtol=1e-5)

    print("KERNEL_OK")
</pallas_src>

<mosaic_0001>
module attributes {stable_mosaic.version = 11 : i64} {
  func.func @_funnel_nchw_kernel(%arg0: i32, %arg1: i32, %arg2: memref<1x64x128xf32, #tpu.memory_space<vmem>>, %arg3: memref<16x128xf32, #tpu.memory_space<vmem>>, %arg4: memref<16x1xf32, #tpu.memory_space<vmem>>, %arg5: memref<1x16x64xf32, #tpu.memory_space<vmem>>) attributes {dimension_semantics = [#tpu.dimension_semantics<parallel>, #tpu.dimension_semantics<parallel>], iteration_bounds = array<i64: 2, 1>, scalar_prefetch = 0 : i64, scratch_operands = 0 : i64, tpu.core_type = #tpu.core_type<tc>, window_params = [{transform_indices = @transform_0, window_bounds = array<i64: 1, 64, 128>}, {pipeline_mode = #tpu.pipeline_mode<synchronous>, transform_indices = @transform_1, window_bounds = array<i64: 16, 128>}, {pipeline_mode = #tpu.pipeline_mode<synchronous>, transform_indices = @transform_2, window_bounds = array<i64: 16, 1>}, {transform_indices = @transform_3, window_bounds = array<i64: 1, 16, 64>}]} {
    %c0 = arith.constant 0 : index
    %c0_0 = arith.constant 0 : index
    %0 = vector.load %arg3[%c0, %c0_0] : memref<16x128xf32, #tpu.memory_space<vmem>>, vector<16x128xf32>
    %c0_1 = arith.constant 0 : index
    %c0_2 = arith.constant 0 : index
    %c0_3 = arith.constant 0 : index
    %1 = vector.load %arg2[%c0_1, %c0_2, %c0_3] : memref<1x64x128xf32, #tpu.memory_space<vmem>>, vector<1x64x128xf32>
    %2 = vector.shape_cast %1 : vector<1x64x128xf32> to vector<64x128xf32>
    %cst = arith.constant dense<0.000000e+00> : vector<16x64xf32>
    %3 = tpu.matmul %0, %2, %cst {dimension_numbers = #tpu.dot_dimension_numbers<[1], [1], [0], [0], [0, 0, 1, 0], [], []>} : vector<16x128xf32>, vector<64x128xf32>, vector<16x64xf32> -> vector<16x64xf32>
    %c0_4 = arith.constant 0 : index
    %c0_5 = arith.constant 0 : index
    %4 = vector.load %arg4[%c0_4, %c0_5] : memref<16x1xf32, #tpu.memory_space<vmem>>, vector<16x1xf32>
    %5 = vector.broadcast %4 : vector<16x1xf32> to vector<16x64xf32>
    %6 = arith.addf %3, %5 : vector<16x64xf32>
    %c0_6 = arith.constant 0 : index
    %c0_7 = arith.constant 0 : index
    %c0_8 = arith.constant 0 : index
    %7 = vector.load %arg5[%c0_6, %c0_7, %c0_8] : memref<1x16x64xf32, #tpu.memory_space<vmem>>, vector<1x16x64xf32>
    %8 = vector.shape_cast %7 : vector<1x16x64xf32> to vector<16x64xf32>
    %9 = vector.shape_cast %6 : vector<16x64xf32> to vector<1x16x64xf32>
    tpu.vector_store %arg5[%c0_6, %c0_7, %c0_8], %9 {strides = array<i32>} : memref<1x16x64xf32, #tpu.memory_space<vmem>>, vector<1x16x64xf32>,
    return
  }
  func.func @transform_0(%arg0: i32, %arg1: i32) -> (i32, i32, i32) {
    %c0_i32 = arith.constant 0 : i32
    %c0_i32_0 = arith.constant 0 : i32
    return %arg0, %arg1, %c0_i32 : i32, i32, i32
  }
  func.func @transform_1(%arg0: i32, %arg1: i32) -> (i32, i32) {
    %c0_i32 = arith.constant 0 : i32
    %c0_i32_0 = arith.constant 0 : i32
    %c0_i32_1 = arith.constant 0 : i32
    return %c0_i32, %c0_i32_0 : i32, i32
  }
  func.func @transform_2(%arg0: i32, %arg1: i32) -> (i32, i32) {
    %c0_i32 = arith.constant 0 : i32
    %c0_i32_0 = arith.constant 0 : i32
    %c0_i32_1 = arith.constant 0 : i32
    return %c0_i32, %c0_i32_0 : i32, i32
  }
  func.func @transform_3(%arg0: i32, %arg1: i32) -> (i32, i32, i32) {
    %c0_i32 = arith.constant 0 : i32
    %c0_i32_0 = arith.constant 0 : i32
    return %arg0, %c0_i32, %arg1 : i32, i32, i32
  }
}

</mosaic_0001>

<bundles_post_ra>
// kernel: tpu_custom_call.1
= control target key start
LH: loop header
LB: loop body
LE: loop exit
PB: predicated region body
PF: predicated region fallthrough
CT: control target
= control target key end

     0   :  { %8 = vsyncpa [#allocation3], 0  ;;  %s868_s0 = inlined_call_operand.hbm [shape: f32[2,64,128], index: 0, kind: input, shape index: {}]   ;;  %s869_s1 = inlined_call_operand.vmem [shape: f32[16,128], index: 1, kind: input, shape index: {}]   ;;  %s870_s2 = inlined_call_operand.vmem [shape: f32[16,1], index: 2, kind: input, shape index: {}]   ;;  %s871_s3 = inlined_call_operand.hbm [shape: f32[2,16,64], index: 3, kind: output, shape index: {}]  }
   0x1   :  { %10 = vsyncpa [#allocation3 + $0x1], 0 }
   0x2   :  { %11 = vsyncpa [#allocation4], 0 }
   0x3   :  { %13 = vsyncpa [#allocation4 + $0x1], 0  ;;  %s680_s12 = smov 0   ;;  %s682_s13 = smov 0  }
   0x4   :  { %s684_s14 = smov 0   ;;  %s686_s15 = smov 0  }
   0x5   :  { %s688_s16 = smov 0   ;;  %s690_s17 = smov 0  }
   0x6 LB: > { %s409_s18 = sadd.s32 4294967295, %s651_s17   ;;  %s410_s19 = sadd.s32 4294967294, %s651_s17   ;;  %s651_s17 = sphi %s690_s17, %s19_s17   ;;  %s647_s16 = sphi %s688_s16, %s886_s16   ;;  %s643_s15 = sphi %s686_s15, %s885_s15   ;;  %s639_s14 = sphi %s684_s14, %s884_s14   ;;  %s635_s13 = sphi %s682_s13, %s883_s13   ;;  %s631_s12 = sphi %s680_s12, %s882_s12  }
   0x7   : > { %s31_s20 = sadd.s32 1, %s647_s16  ;;  %s40_s21 = sadd.s32 1, %s639_s14 }
   0x8   : > { %p33_p0 = scmp.ge.s32.totalorder %s31_s20, 2  ;;  %p47_p1 = scmp.ne.s32.totalorder %s639_s14, %s635_s13 }
   0x9   : > { %p48_p2 = scmp.eq.s32.totalorder %s651_s17, 0  ;;  %p53_p3 = scmp.ne.s32.totalorder %s635_s13, %s631_s12 }
   0xa   : > { %s888_s20 = smov (%p33_p0, %s31_s20), 0  ;;  %p54_p5 = scmp.eq.s32.totalorder %s409_s18, 0 }
   0xb   : > { %p721_p4 = por %p48_p2, %p47_p1  ;;  %s35_s23 = ssub.s32 %s647_s16, %s888_s20 }
   0xc   : > { %p121_p6 = scmp.eq.s32.totalorder %s409_s18, 1  ;;  %p38_p7 = scmp.eq.s32.totalorder %s35_s23, 0 }
   0xd   : > { %p727_p8 = por %p54_p5, %p53_p3  ;;  %p127_p10 = scmp.eq.s32.totalorder %s410_s19, 1 }
   0xe   : > { %p731_p9 = por %p121_p6, %p47_p1  ;;  %p483_p13 = scmp.lt.s32.totalorder %s651_s17, 2 }
   0xf   : > { %s736_s26 = scalar_select %p38_p7, %s639_s14, %s40_s21  }
  0x10   : > { %s875_s25 = scalar_select %p731_p9, 1, 0 }
  0x11   : > { %p738_p11 = por %p127_p10, %p53_p3  ;;  %s153_s28 = sand.u32 1, %s639_s14  }
  0x12   : > { %s413_s29 = sshll.u32 %s153_s28, 6  ;;  %s424_s30 = sshll.u32 %s647_s16, 10 }
  0x13   : > { %s876_s27 = scalar_select %p738_p11, 1, 0 }
  0x14   : > { %s749_s6 = scalar_lea.hbm %s868_s0, %s424_s30  ;;  %s157_s7 = scalar_lea.vmem [#allocation2], %s413_s29 }
  0x15   : > { %s166_s8 = sshll.u32 %s157_s7, 4  ;;  %p755_p0 = pnand %p483_p13, %p721_p4  ;;  %s751_s8 = int_to_ptr.vmem [resolvable:$true] %s166_s8 }
  0x16   : > { %s760_s10 = scalar_lea.sflag [#allocation3], %s153_s28  ;;  %s539_s11 = scalar_lea.hbm %s749_s6, 1024 }
  0x17   : > { %p540_p2 = scmp.ne.s32.totalorder %s749_s6, %s539_s11  ;;  %p541_p3 = pneg %p755_p0 }
  0x18   : > { %s544_s21 = scalar_lea.hbm %s868_s0, 2048  ;;  %p545_p4 = scmp.lt.u32.totalorder %s749_s6, %s868_s0 }
  0x19   : > { %p542_p5 = pnand %p541_p3, %p540_p2  ;;  %p546_p7 = scmp.lt.u32.totalorder %s544_s21, %s539_s11 }
  0x1a   : > { %p548_p13 = scmp.lt.u32.totalorder %s539_s11, %s749_s6 }
  0x1b   : > { %p543_p6 = pneg %p542_p5  ;;  %p547_p10 = por %p546_p7, %p545_p4 }
  0x1d   : > { %p549_p12 = por %p548_p13, %p547_p10 }
  0x1f   : > { %p550_p1 = pnand %p549_p12, %p543_p6 }
  0x21   : > { %553 = shalt.err (!%p550_p1)
}
  0x22   : > { %s554_s28 = scalar_lea.vmem %s751_s8, 1024  ;;  %s653_s29 = smov [#allocation2]  }
  0x23   : > { %p555_p2 = scmp.ne.s32.totalorder %s751_s8, %s554_s28  ;;  %s559_s30 = sshll.u32 %s653_s29, 4  ;;  %s560_s30 = int_to_ptr.vmem [resolvable:$false] %s559_s30 }
  0x24   : > { %s561_s4 = scalar_lea.vmem %s560_s30, 2048  ;;  %p562_p9 = scmp.lt.s32.totalorder %s751_s8, %s560_s30 }
  0x25   : > { %p557_p5 = pnand %p555_p2, %p541_p3  ;;  %p563_p4 = scmp.lt.s32.totalorder %s561_s4, %s554_s28 }
  0x27   : > { %p558_p11 = pneg %p557_p5  ;;  %p564_p7 = por %p563_p4, %p562_p9 }
  0x29   : > { %p565_p10 = pnand %p564_p7, %p558_p11 }
  0x2b   : > { %568 = shalt.err (!%p565_p10)
}
  0x2c   : > { %s654_s5 = smov 128   ;;  %s655_s7 = smov 8  }
  0x2d   : > { %478 = dma.hbm_to_vmem [thread:$0]  (!%p755_p0), %s749_s6, 1024, %s751_s8, %s760_s10, %s654_s5, %s654_s5, %s655_s7  }
  0x2e   : > { %p174_p12 = scmp.lt.s32.totalorder %s651_s17, 3  ;;  %p878_p1 = scmp.ge.s32.totalorder %s651_s17, 1 }
  0x30   : > { %p175_p3 = pnand %p878_p1, %p174_p12 }
  0x31   : > { %s792_s11 = sand.u32 (!%p175_p3), 1, %s635_s13  }
  0x32   : > { %178 = sbr.rel (%p175_p3) target bundleno = 323 (0x143), region = 32  ;;  %s417_s18 = sshll.u32 (!%p175_p3), %s792_s11, 6 }
  0x33   : > { %s181_s19 = scalar_lea.sflag (!%p175_p3), [#allocation3], %s792_s11  ;;  %s184_s21 = scalar_lea.vmem (!%p175_p3), [#allocation2], %s417_s18 }
  0x39   : > { %622 = dma.done.wait (%p727_p8), %s181_s19, 1024  }
  0x3a   : > { %624 = vsyncadd (%p727_p8), %s181_s19, 4294966272  ;;  %v656_v0 = vmov 0   ;;  %v210_v1 = vld [vmem:[%s184_s21] sm:$0xff]  ;;  %v211_v2 = vld [vmem:[%s184_s21 + $0x8] sm:$0xff]  ;;  %s418_s29 = sshll.u32 %s792_s11, 4  ;;  %s425_s5 = sshll.u32 %s643_s15, 8 }
  0x3b   : > { %538 = vset.pattern.permute.xlu0 %v656_v0  ;;  %v212_v3 = vld [vmem:[%s184_s21 + $0x10] sm:$0xff]  ;;  %v455_v4 = vpack.c.bf16 %v211_v2, %v210_v1  ;;  %v213_v5 = vld [vmem:[%s184_s21 + $0x18] sm:$0xff]  ;;  %v208_v7 = vld [vmem:[%s869_s1] sm:$0xff]  ;;  %s206_s30 = scalar_lea.vmem [#allocation5], %s418_s29  ;;  %vm305_vm0 = vcmask 523264   ;;  %s819_s19 = scalar_lea.hbm %s871_s3, %s425_s5 }
  0x3c   : > { %v459_v6 = vpack.c.bf16 %v213_v5, %v212_v3  ;;  %452 = vmatprep.mubr.f32.mxu0 %v208_v7  ;;  %v218_v8 = vld [vmem:[%s870_s2] sm:$0xff]  ;;  %v219_v9 = vld [vmem:[%s870_s2 + $0x8] sm:$0xff]  ;;  %v216_v13 = vld [vmem:[%s184_s21 + $0x30] sm:$0xff]  ;;  %s323_s4 = sshll.u32 %s206_s30, 4  ;;  %p879_p9 = scmp.ne.s32.totalorder %s875_s25, 0  ;;  %s814_s4 = int_to_ptr.vmem [resolvable:$true] %s323_s4 }
  0x3d   : > { %456 = vmatprep.subr.bf16.mxu0 %v455_v4  ;;  %222 = vperm.xlu0 %538, %v218_v8   ;;  %v214_v10 = vld [vmem:[%s184_s21 + $0x20] sm:$0xff]  ;;  %v215_v11 = vld [vmem:[%s184_s21 + $0x28] sm:$0xff]  ;;  %v217_v14 = vld [vmem:[%s184_s21 + $0x38] sm:$0xff]  ;;  %s309_s21 = scalar_lea.sflag [#allocation4], %s792_s11  ;;  %s569_s15 = scalar_lea.vmem %s814_s4, 256 }
  0x3e   : > { %458 = vmatpush3.bf16.xpose.msra.mxu0 %v455_v4  ;;  %v463_v12 = vpack.c.bf16 %v215_v11, %v214_v10  ;;  %v467_v15 = vpack.c.bf16 %v217_v14, %v216_v13  ;;  %v209_v16 = vld [vmem:[%s869_s1 + $0x8] sm:$0xff]  ;;  %p570_p8 = scmp.ne.s32.totalorder %s814_s4, %s569_s15  ;;  %s657_s6 = smov [#allocation5]  }
  0x3f   : > { %460 = vmatprep.subr.bf16.mxu0 %v459_v6  ;;  %s573_s8 = sshll.u32 %s657_s6, 4  ;;  %s574_s8 = int_to_ptr.vmem [resolvable:$false] %s573_s8 }
  0x40   : > { %p571_p11 = pnand %p570_p8, %p879_p9  ;;  %s575_s9 = scalar_lea.vmem %s574_s8, 512 }
  0x41   : > { %227 = vperm.xlu0 %538, %v219_v9   ;;  %p576_p6 = scmp.lt.s32.totalorder %s814_s4, %s574_s8  ;;  %p577_p13 = scmp.lt.s32.totalorder %s575_s9, %s569_s15 }
  0x42   : > { %p572_p0 = pneg %p571_p11 }
  0x43   : > { %p578_p2 = por %p577_p13, %p576_p6 }
  0x45   : > { %p579_p5 = pnand %p578_p2, %p572_p0 }
  0x46   : > { %462 = vmatpush3.bf16.xpose.msra.mxu0 %v459_v6 }
  0x47   : > { %464 = vmatprep.subr.bf16.mxu0 %v463_v12 }
  0x4e   : > { %466 = vmatpush3.bf16.xpose.msra.mxu0 %v463_v12 }
  0x4f   : > { %468 = vmatprep.subr.bf16.mxu0 %v467_v15 }
  0x56   : > { %470 = vmatpush3.bf16.xpose.msra.mxu0 %v467_v15 }
  0x5d   : > { %453 = vmatmul.mubr.f32.vlgmr.msra.gmra.mrb[0].mxu0 %v209_v16 }
  0xbc   : > { %v223_v17 = vpop.permute.xlu0 %222 }
  0xc0   : > { %v228_v18 = vpop.permute.xlu0 %227 }
 0x130   : > { %v454_v19 = vpop.f32.mrb[0].mxu0 }
 0x131   : > { %v302_v20 = vadd.f32 %v454_v19, %v228_v18  ;;  %v296_v21 = vpop.f32.mrb[1].mxu0 }
 0x132   : > { %v297_v22 = vadd.f32 %v296_v21, %v223_v17 }
 0x133   : > { %307 = vst.msk [vmem:[%s206_s30 + $0x8] sm:$0xff] %vm305_vm0, %v302_v20 }
 0x134   : > { %306 = vst.msk [vmem:[%s206_s30] sm:$0xff] %vm305_vm0, %v297_v22 }
 0x135   : > { %582 = shalt.err (!%p579_p5)
}
 0x136   : > { %s583_s10 = scalar_lea.hbm %s819_s19, 256  ;;  %s587_s23 = scalar_lea.hbm %s871_s3, 512 }
 0x137   : > { %p584_p4 = scmp.ne.s32.totalorder %s819_s19, %s583_s10  ;;  %p588_p12 = scmp.lt.u32.totalorder %s819_s19, %s871_s3 }
 0x138   : > { %p589_p1 = scmp.lt.u32.totalorder %s587_s23, %s583_s10  ;;  %p591_p8 = scmp.lt.u32.totalorder %s583_s10, %s819_s19 }
 0x139   : > { %p585_p7 = pnand %p584_p4, %p879_p9 }
 0x13a   : > { %p590_p3 = por %p589_p1, %p588_p12 }
 0x13b   : > { %p586_p10 = pneg %p585_p7 }
 0x13c   : > { %p592_p11 = por %p591_p8, %p590_p3 }
 0x13e   : > { %p593_p0 = pnand %p592_p11, %p586_p10 }
 0x140   : > { %596 = shalt.err (!%p593_p0)
}
 0x141   : > { %s658_s30 = smov 128   ;;  %s659_s5 = smov 8  }
 0x142   : > { %473 = dma.vmem_to_hbm [thread:$0]  (%p879_p9), %s814_s4, 256, %s819_s19, %s309_s21, %s658_s30, %s658_s30, %s659_s5  }
 0x143 PF: > { %s338_s7 = sand.u32 1, %s631_s12   ;;  %p880_p6 = scmp.ne.s32.totalorder %s876_s27, 0 }
 0x144   : > { %p881_p13 = scmp.ge.s32.totalorder %s651_s17, 2  ;;  %s339_s18 = scalar_lea.sflag [#allocation4], %s338_s7 }
 0x146   : > { %p480_p2 = pnand %p881_p13, %p880_p6 }
 0x148   : > { %626 = dma.done.wait (!%p480_p2), %s339_s18, 256  }
 0x149   : > { %628 = vsyncadd (!%p480_p2), %s339_s18, 4294967040  ;;  %s19_s17 = sadd.s32 1, %s651_s17   ;;  %s882_s12 = smov %s635_s13 }
 0x14a   : > { %p16_p5 = scmp.ge.s32.totalorder %s19_s17, 4   ;;  %s883_s13 = smov %s639_s14 }
 0x14b   : > { %s884_s14 = smov %s736_s26  ;;  %s885_s15 = smov %s647_s16 }
 0x14c   : > { %s886_s16 = smov %s888_s20  ;;  %18 = sbr.rel (!%p16_p5) target bundleno = 6 (0x6), region = 77 }
 0x153   :  { %344 = vsyncpa [#allocation3], 1 }
 0x154   :  { %346 = vsyncpa [#allocation3 + $0x1], 1 }
 0x155   :  { %347 = vsyncpa [#allocation4], 1 }
 0x156   :  { %349 = vsyncpa [#allocation4 + $0x1], 1 }

</bundles_post_ra>
